<compile_context>
chip_gen: v7x
topology: tpu7x:2x2x1
jax: 0.10.0
libtpu: 0.0.40
codegen_flags: <defaults>
</compile_context>

<pallas_src>
import functools

import jax
import jax.numpy as jnp
from jax.experimental import pallas as pl
from jax.experimental.pallas import tpu as pltpu


_MAX_LANE_COLS = 8192   # widest lane extent considered when re-factorizing the flat buffer
_MAX_LANE_TILE = 4096   # max lanes per block (multiple of 128)


# --------------------------------------------------------------------------- #
# Kernels
# --------------------------------------------------------------------------- #
def _alias_kernel(x_ref, o_ref):
    """Zero-copy flatten: the output buffer *is* the input buffer.

    With `input_output_aliases={0: 0}` and `memory_space=pl.ANY` on both specs
    no DMA and no VMEM staging are generated; `pltpu.touch` only pins a write
    dependency so the aliased output counts as produced.
    """
    del x_ref
    pltpu.touch(o_ref)


def _copy_kernel(x_ref, o_ref):
    """Identity copy: the whole "compute" of a flatten is moving the bytes."""
    o_ref[...] = x_ref[...]


# --------------------------------------------------------------------------- #
# Tiling helpers (copy path)
# --------------------------------------------------------------------------- #
def _sublane_multiple(dtype) -> int:
    """Sublane packing multiple: 8 for 32-bit, 16 for bf16/f16, 32 for int8/fp8."""
    itemsize = jnp.dtype(dtype).itemsize
    return 8 * max(1, 4 // itemsize)


def _round_up(x: int, m: int) -> int:
    return ((x + m - 1) // m) * m


def _largest_divisor_multiple(dim: int, base: int, cap: int):
    """Largest multiple of `base` that divides `dim` and is <= cap (None if none)."""
    best = None
    t = base
    limit = min(dim, cap)
    while t <= limit:
        if dim % t == 0:
            best = t
        t += base
    return best


@functools.lru_cache(maxsize=1)
def _block_budget():
    """(target block bytes, vmem_limit_bytes) derived from the chip generation."""
    try:
        vmem = int(getattr(pltpu.get_tpu_info(), "vmem_capacity_bytes"))
    except Exception:
        vmem = None
    if vmem is not None and vmem <= 80 * 1024 * 1024:
        # v7x-class: 64 MiB VMEM but 3.2 TB/s HBM -> 6 MiB blocks keep the
        # ~0.35 us per-grid-step overhead <10%; raise the scoped limit so
        # 2 arrays x 2 buffers x 6 MiB (= 24 MiB) + internal scratch fits.
        return 6 * 1024 * 1024, 48 * 1024 * 1024
    # v5e / v6e (128 MiB VMEM, 16 / 32 MiB scoped default): 2 MiB blocks give an
    # 8 MiB double-buffered working set and already sit ~85% of HBM roofline.
    return 2 * 1024 * 1024, None


def _plan_2d(total: int, dtype, block_bytes: int):
    """Pick a lane-dense (rows, cols) slab and a (tile_r, tile_c) block for it.

    Guarantees rows * cols >= total; when strictly greater, the wrapper
    zero-pads the flat buffer so every block is a legal, VMEM-sized,
    unmasked-store tile even for ragged / prime-ish sizes.
    """
    itemsize = jnp.dtype(dtype).itemsize
    sub = _sublane_multiple(dtype)

    candidates = [c for c in range(128, min(total, _MAX_LANE_COLS) + 1, 128)
                  if total % c == 0]
    if candidates:
        packed = [c for c in candidates if (total // c) % sub == 0]
        pool = packed or candidates
        narrow = [c for c in pool if c <= _MAX_LANE_TILE]
        cols = max(narrow) if narrow else min(pool)
        rows = total // cols
    else:
        # No multiple-of-128 factor exists: pad up to a fixed lane-dense width.
        cols = min(512, _round_up(total, 128))
        rows = (total + cols - 1) // cols

    tile_c = _largest_divisor_multiple(cols, 128, _MAX_LANE_TILE)  # cols % 128 == 0
    row_cap = max(sub, block_bytes // max(1, tile_c * itemsize))
    tile_r = _largest_divisor_multiple(rows, sub, row_cap)
    if tile_r is None:
        if rows <= row_cap:
            tile_r = rows                      # small full-extent block, still cheap
        else:
            rows = _round_up(rows, sub)        # pad rows so a sublane-packed tile exists
            tile_r = _largest_divisor_multiple(rows, sub, row_cap)
    return rows, cols, tile_r, tile_c


# --------------------------------------------------------------------------- #
# Wrappers
# --------------------------------------------------------------------------- #
def _flatten_alias(x: jax.Array, out_shape) -> jax.Array:
    """Zero-copy Pallas flatten via input/output aliasing (no VMEM staging)."""
    x_flat = jnp.reshape(x, out_shape)   # metadata-only re-view of the same bytes
    return pl.pallas_call(
        _alias_kernel,
        out_shape=jax.ShapeDtypeStruct(out_shape, x.dtype),
        in_specs=[pl.BlockSpec(memory_space=pl.ANY)],
        out_specs=pl.BlockSpec(memory_space=pl.ANY),
        input_output_aliases={0: 0},
    )(x_flat)


def _flatten_copy(x: jax.Array, out_shape) -> jax.Array:
    """Tiled HBM-roofline identity copy through VMEM."""
    total = int(x.size)
    itemsize = jnp.dtype(x.dtype).itemsize
    block_bytes, vmem_limit = _block_budget()
    rows, cols, tile_r, tile_c = _plan_2d(total, x.dtype, block_bytes)

    padded = rows * cols
    flat = jnp.reshape(x, (total,))
    if padded != total:
        flat = jnp.pad(flat, (0, padded - total))
    x2d = jnp.reshape(flat, (rows, cols))

    if tile_c == cols:                         # block spans full width -> 1-D grid
        grid = (rows // tile_r,)
        spec = pl.BlockSpec((tile_r, cols), lambda i: (i, 0))
        dims = ("parallel",)
    else:
        grid = (rows // tile_r, cols // tile_c)
        spec = pl.BlockSpec((tile_r, tile_c), lambda i, j: (i, j))
        dims = ("parallel", "parallel")

    extra = {"vmem_limit_bytes": vmem_limit} if vmem_limit is not None else {}
    out2d = pl.pallas_call(
        _copy_kernel,
        out_shape=jax.ShapeDtypeStruct((rows, cols), x.dtype),
        grid=grid,
        in_specs=[spec],
        out_specs=spec,
        compiler_params=pltpu.CompilerParams(dimension_semantics=dims, **extra),
        cost_estimate=pl.CostEstimate(
            flops=0, transcendentals=0, bytes_accessed=2 * padded * itemsize),
    )(x2d)

    out_flat = jnp.reshape(out2d, (padded,))
    if padded != total:
        out_flat = out_flat[:total]
    return jnp.reshape(out_flat, out_shape)


def flatten(x: jax.Array, full: bool = False, mode: str = "alias") -> jax.Array:
    """JAX/Pallas equivalent of `Flatten(full).forward(x)`.

    mode="alias"   zero-copy Pallas kernel (input_output_aliases, default)
    mode="copy"    tiled HBM-roofline identity-copy Pallas kernel
    mode="reshape" plain jnp.reshape (no kernel at all; truly optimal)
    """
    if full:
        out_shape = (x.size,)
    else:
        lead = x.shape[0] if x.ndim >= 1 else 1
        out_shape = (lead, x.size // max(lead, 1))

    if x.size == 0 or mode == "reshape":
        return jnp.reshape(x, out_shape)

    if mode == "alias":
        try:
            return _flatten_alias(x, out_shape)
        except Exception:
            # Fall back to the tiled copy if the aliased / ANY-space path is
            # unavailable in this jax / libtpu build.
            pass
    return _flatten_copy(x, out_shape)


if __name__ == "__main__":
    key = jax.random.PRNGKey(0)
    # Small NCHW input consistent with a conv-net feature map.
    x = jax.random.normal(key, (2, 4, 16, 16), dtype=jnp.float32)

    # Default (zero-copy alias) path, full=False: (2, 4, 16, 16) -> (2, 1024).
    y = jax.block_until_ready(flatten(x, full=False))
    assert y.shape == (2, 4 * 16 * 16), y.shape
    assert jnp.array_equal(y, jnp.reshape(x, (2, -1)))

    # Default path, full=True: (2, 4, 16, 16) -> (2048,).
    y_full = jax.block_until_ready(flatten(x, full=True))
    assert y_full.shape == (2 * 4 * 16 * 16,), y_full.shape
    assert jnp.array_equal(y_full, jnp.reshape(x, (-1,)))

    # Tiled identity-copy path (f32).
    y_copy = jax.block_until_ready(flatten(x, full=False, mode="copy"))
    assert jnp.array_equal(y_copy, jnp.reshape(x, (2, -1)))

    # Sub-32-bit dtype through the copy path (sublane packing = 16 for bf16).
    xb = x.astype(jnp.bfloat16)
    yb = jax.block_until_ready(flatten(xb, full=True, mode="copy"))
    assert yb.shape == (2048,), yb.shape
    assert jnp.array_equal(yb, jnp.reshape(xb, (-1,)))

    # Ragged size (no multiple-of-128 factor) exercises the padded fallback.
    xr = jax.random.normal(jax.random.PRNGKey(1), (2, 3, 5, 7), dtype=jnp.float32)
    yr = jax.block_until_ready(flatten(xr, full=True, mode="copy"))
    assert yr.shape == (2 * 3 * 5 * 7,), yr.shape
    assert jnp.array_equal(yr, jnp.reshape(xr, (-1,)))

    print("KERNEL_OK")
</pallas_src>

<mosaic_0001>
module attributes {stable_mosaic.version = 11 : i64} {
  func.func @_alias_kernel(%arg0: memref<2x1024xf32, #tpu.memory_space<any>>, %arg1: memref<2x1024xf32, #tpu.memory_space<any>>) attributes {dimension_semantics = [], scalar_prefetch = 0 : i64, scratch_operands = 0 : i64, tpu.core_type = #tpu.core_type<tc>} {
    return
  }
}

module attributes {stable_mosaic.version = 11 : i64} {
  func.func @_copy_kernel(%arg0: i32, %arg1: memref<8x256xf32, #tpu.memory_space<vmem>>, %arg2: memref<8x256xf32, #tpu.memory_space<vmem>>) attributes {dimension_semantics = [#tpu.dimension_semantics<parallel>], iteration_bounds = array<i64: 1>, scalar_prefetch = 0 : i64, scratch_operands = 0 : i64, tpu.core_type = #tpu.core_type<tc>, window_params = [{transform_indices = @transform_0, window_bounds = array<i64: 8, 256>}, {transform_indices = @transform_1, window_bounds = array<i64: 8, 256>}]} {
    %c0 = arith.constant 0 : index
    %c0_0 = arith.constant 0 : index
    %0 = vector.load %arg1[%c0, %c0_0] : memref<8x256xf32, #tpu.memory_space<vmem>>, vector<8x256xf32>
    %c0_1 = arith.constant 0 : index
    %c0_2 = arith.constant 0 : index
    %1 = vector.load %arg2[%c0_1, %c0_2] : memref<8x256xf32, #tpu.memory_space<vmem>>, vector<8x256xf32>
    tpu.vector_store %arg2[%c0_1, %c0_2], %0 {strides = array<i32>} : memref<8x256xf32, #tpu.memory_space<vmem>>, vector<8x256xf32>,
    return
  }
  func.func @transform_0(%arg0: i32) -> (i32, i32) {
    %c0_i32 = arith.constant 0 : i32
    %c0_i32_0 = arith.constant 0 : i32
    return %arg0, %c0_i32 : i32, i32
  }
  func.func @transform_1(%arg0: i32) -> (i32, i32) {
    %c0_i32 = arith.constant 0 : i32
    %c0_i32_0 = arith.constant 0 : i32
    return %arg0, %c0_i32 : i32, i32
  }
}

</mosaic_0001>

<bundles_post_ra>
// kernel: tpu_custom_call.1
= control target key start
LH: loop header
LB: loop body
LE: loop exit
PB: predicated region body
PF: predicated region fallthrough
CT: control target
= control target key end

     0   :  { %s16_s0 = inlined_call_operand.hbm [shape: f32[2,1024], index: 0, kind: input, shape index: {}, may-alias: {0,1}]   ;;  %s17_s1 = inlined_call_operand.hbm [shape: f32[2,1024], index: 1, kind: output, shape index: {}, may-alias: {0,1}]  }

// kernel: tpu_custom_call.1
= control target key start
LH: loop header
LB: loop body
LE: loop exit
PB: predicated region body
PF: predicated region fallthrough
CT: control target
= control target key end

     0   :  { %6 = vsyncpa [#allocation3], 0  ;;  %s126_s0 = inlined_call_operand.hbm [shape: f32[8,256], index: 0, kind: input, shape index: {}]   ;;  %s127_s1 = inlined_call_operand.hbm [shape: f32[8,256], index: 1, kind: output, shape index: {}]  }
   0x1   :  { %7 = vsyncpa [#allocation4], 0  ;;  %s90_s6 = smov [#allocation2]   ;;  %s42_s10 = scalar_lea.hbm %s126_s0, 256 }
   0x2   :  { %s14_s7 = sshll.u32 %s90_s6, 4  ;;  %p43_p0 = scmp.ne.s32.totalorder %s126_s0, %s42_s10  ;;  %s15_s7 = int_to_ptr.vmem [resolvable:$true] %s14_s7 }
   0x3   :  { %p46_p1 = scmp.lt.u32.totalorder %s42_s10, %s126_s0 }
   0x5   :  { %p48_p2 = pnand %p46_p1, %p43_p0 }
   0x7   :  { %51 = shalt.err (!%p48_p2)
}
   0x8   :  { %s52_s15 = scalar_lea.vmem %s15_s7, 256  ;;  %p57_p4 = scmp.lt.s32.totalorder %s15_s7, %s15_s7 }
   0x9   :  { %p53_p3 = scmp.ne.s32.totalorder %s15_s7, %s52_s15  ;;  %p58_p5 = scmp.lt.s32.totalorder %s52_s15, %s52_s15 }
   0xb   :  { %p59_p6 = por %p58_p5, %p57_p4 }
   0xd   :  { %p60_p7 = pnand %p59_p6, %p53_p3 }
   0xf   :  { %63 = shalt.err (!%p60_p7)
}
  0x10   :  { %17 = dma.hbm_to_vmem [thread:$0]  %s126_s0, 256, %s15_s7, [#allocation3]  }
  0x11   :  { %86 = dma.done.wait [#allocation3], 256  }
  0x12   :  { %87 = vsyncadd [#allocation3], 4294967040  ;;  %s91_s18 = smov [#allocation5]   ;;  %v21_v0 = vld [vmem:[#allocation2] sm:$0xff]  ;;  %v22_v1 = vld [vmem:[#allocation2 + $0x8] sm:$0xff] }
  0x13   :  { %s31_s19 = sshll.u32 %s91_s18, 4  ;;  %23 = vst [vmem:[#allocation5] sm:$0xff] %v21_v0  ;;  %24 = vst [vmem:[#allocation5 + $0x8] sm:$0xff] %v22_v1  ;;  %s32_s19 = int_to_ptr.vmem [resolvable:$true] %s31_s19 }
  0x14   :  { %s64_s20 = scalar_lea.vmem %s32_s19, 256  ;;  %p69_p9 = scmp.lt.s32.totalorder %s32_s19, %s32_s19 }
  0x15   :  { %p65_p8 = scmp.ne.s32.totalorder %s32_s19, %s64_s20  ;;  %p70_p10 = scmp.lt.s32.totalorder %s64_s20, %s64_s20 }
  0x17   :  { %p71_p11 = por %p70_p10, %p69_p9 }
  0x19   :  { %p72_p12 = pnand %p71_p11, %p65_p8 }
  0x1b   :  { %75 = shalt.err (!%p72_p12)
}
  0x1c   :  { %s76_s0 = scalar_lea.hbm %s127_s1, 256 }
  0x1d   :  { %p77_p13 = scmp.ne.s32.totalorder %s127_s1, %s76_s0  ;;  %p80_p0 = scmp.lt.u32.totalorder %s76_s0, %s127_s1 }
  0x1f   :  { %p82_p1 = pnand %p80_p0, %p77_p13 }
  0x21   :  { %85 = shalt.err (!%p82_p1)
}
  0x22   :  { %34 = dma.vmem_to_hbm [thread:$0]  %s32_s19, 256, %s127_s1, [#allocation4]  }
  0x23   :  { %88 = dma.done.wait [#allocation4], 256  }
  0x24   :  { %89 = vsyncadd [#allocation4], 4294967040 }
  0x25   :  { %38 = vsyncpa [#allocation3], 1 }
  0x26   :  { %39 = vsyncpa [#allocation4], 1 }

</bundles_post_ra>
